<compile_context>
chip_gen: v6e
topology: v6e:2x2x1
jax: 0.10.0
libtpu: 0.0.40
codegen_flags: <defaults>
</compile_context>

<pallas_src>
import functools

import jax
import jax.numpy as jnp
from jax import lax
from jax.experimental import pallas as pl
from jax.experimental.pallas import tpu as pltpu


def _layer_norm_kernel(eps, x_ref, g_ref, o_ref):
    # x_ref: (TB, C, TN)   g_ref: (1, C, 1)   o_ref: (TB, C, TN)
    x = x_ref[...].astype(jnp.float32)
    c = x.shape[1]
    inv_c = 1.0 / c

    # mean / biased variance over the channel axis (fully resident in-block).
    mean = jnp.sum(x, axis=1, keepdims=True) * inv_c          # (TB, 1, TN)
    xc = x - mean
    var = jnp.sum(xc * xc, axis=1, keepdims=True) * inv_c     # (TB, 1, TN)

    inv_std = lax.rsqrt(var + eps)                            # EUP
    g = g_ref[...].astype(jnp.float32)                        # (1, C, 1)
    o_ref[...] = (xc * inv_std * g).astype(o_ref.dtype)       # single store


_BLOCK_BUDGET_BYTES = 4 << 20    # ~4 MiB/block -> 16 MiB double-buffered in+out
_SINGLE_BLOCK_BYTES = 4 << 20    # whole-array fast path threshold


def _pick_tiles(b, c, n, itemsize):
    """Choose (TB, TN) batch/spatial block sizes (dtype-aware byte budget)."""
    total = b * c * n * itemsize
    if total <= _SINGLE_BLOCK_BYTES:
        # Tiny activation: one block, no pipelining bookkeeping at all.
        return b, n

    # Spatial (lane) tile: a multiple of 128 bounded by the per-block budget.
    # Partial edge blocks (N % TN != 0) are legal -- reads are padded and the
    # writeback is masked; the per-lane-independent math can't contaminate
    # valid lanes.
    if n < 128:
        tn = n                                    # full extent (always legal)
    else:
        budget_lanes = max(128, _BLOCK_BUDGET_BYTES // (c * itemsize))
        budget_lanes = (budget_lanes // 128) * 128
        tn = min((n // 128) * 128, budget_lanes)

    # Batch tile: fill the remaining byte budget.  This keeps bytes-per-step
    # large even for small channel counts (where a (1, C, TN) slab is tiny and
    # per-step overhead would dominate).
    tb = max(1, _BLOCK_BUDGET_BYTES // (c * tn * itemsize))
    tb = min(tb, b)
    return tb, tn


def layer_norm(x, g):
    """Channel-wise LayerNorm.  x: (B, C, H, W), g: (1, C, 1, 1)."""
    B, C, H, W = x.shape
    N = H * W
    eps = 1e-5 if x.dtype == jnp.float32 else 1e-3
    itemsize = jnp.dtype(x.dtype).itemsize

    x3 = x.reshape(B, C, N)                 # lane-dense last dim (free reshape)
    g3 = jnp.asarray(g).reshape(1, C, 1)

    tb, tn = _pick_tiles(B, C, N, itemsize)
    grid = (pl.cdiv(B, tb), pl.cdiv(N, tn))

    # Purely memory-bound op: give XLA's scheduler an accurate picture.
    cost = pl.CostEstimate(
        flops=6 * B * C * N,
        transcendentals=B * N,
        bytes_accessed=2 * B * C * N * itemsize + C * itemsize,
    )

    out = pl.pallas_call(
        functools.partial(_layer_norm_kernel, eps),
        out_shape=jax.ShapeDtypeStruct((B, C, N), x.dtype),
        grid=grid,
        in_specs=[
            pl.BlockSpec((tb, C, tn), lambda bi, ni: (bi, 0, ni)),
            pl.BlockSpec((1, C, 1), lambda bi, ni: (0, 0, 0)),
        ],
        out_specs=pl.BlockSpec((tb, C, tn), lambda bi, ni: (bi, 0, ni)),
        compiler_params=pltpu.CompilerParams(
            dimension_semantics=("parallel", "parallel"),
            # Raise v5e's 16 MiB default scoped VMEM; no-op on v6e/v7x and
            # well under v7x's 64 MiB physical VMEM.
            vmem_limit_bytes=32 * 1024 * 1024,
        ),
        cost_estimate=cost,
    )(x3, g3)

    return out.reshape(B, C, H, W)


def _reference(x, g):
    eps = 1e-5 if x.dtype == jnp.float32 else 1e-3
    mean = jnp.mean(x, axis=1, keepdims=True)
    var = jnp.var(x, axis=1, keepdims=True)   # ddof=0 == unbiased=False
    return (x - mean) * lax.rsqrt(var + eps) * g


if __name__ == "__main__":
    key = jax.random.PRNGKey(0)
    B, C, H, W = 2, 4, 16, 16

    kx, kg = jax.random.split(key)
    x = jax.random.normal(kx, (B, C, H, W), dtype=jnp.float32)
    # nn.Parameter(torch.ones(...)) init, perturbed so the g-multiply is tested.
    g = jnp.ones((1, C, 1, 1), jnp.float32) \
        + 0.1 * jax.random.normal(kg, (1, C, 1, 1), dtype=jnp.float32)

    out = layer_norm(x, g)
    out = jax.block_until_ready(out)

    ref = _reference(x, g)
    assert out.shape == (B, C, H, W)
    assert jnp.allclose(out, ref, atol=1e-5, rtol=1e-5), "mismatch vs reference"

    print("KERNEL_OK")
</pallas_src>

<mosaic_0001>
module attributes {stable_mosaic.version = 11 : i64} {
  func.func @_layer_norm_kernel(%arg0: i32, %arg1: i32, %arg2: memref<2x4x256xf32, #tpu.memory_space<vmem>>, %arg3: memref<1x4x1xf32, #tpu.memory_space<vmem>>, %arg4: memref<2x4x256xf32, #tpu.memory_space<vmem>>) attributes {dimension_semantics = [#tpu.dimension_semantics<parallel>, #tpu.dimension_semantics<parallel>], iteration_bounds = array<i64: 1, 1>, scalar_prefetch = 0 : i64, scratch_operands = 0 : i64, tpu.core_type = #tpu.core_type<tc>, window_params = [{transform_indices = @transform_0, window_bounds = array<i64: 2, 4, 256>}, {pipeline_mode = #tpu.pipeline_mode<synchronous>, transform_indices = @transform_1, window_bounds = array<i64: 1, 4, 1>}, {transform_indices = @transform_2, window_bounds = array<i64: 2, 4, 256>}]} {
    %c0 = arith.constant 0 : index
    %c0_0 = arith.constant 0 : index
    %c0_1 = arith.constant 0 : index
    %0 = vector.load %arg2[%c0, %c0_0, %c0_1] : memref<2x4x256xf32, #tpu.memory_space<vmem>>, vector<2x4x256xf32>
    %cst = arith.constant dense<0.000000e+00> : vector<2x256xf32>
    %1 = vector.multi_reduction <add>, %0, %cst [1] : vector<2x4x256xf32> to vector<2x256xf32>
    %2 = vector.shape_cast %1 : vector<2x256xf32> to vector<2x1x256xf32>
    %cst_2 = arith.constant 2.500000e-01 : f32
    %3 = vector.broadcast %cst_2 : f32 to vector<2x1x256xf32>
    %4 = arith.mulf %2, %3 : vector<2x1x256xf32>
    %5 = vector.broadcast %4 : vector<2x1x256xf32> to vector<2x4x256xf32>
    %6 = arith.subf %0, %5 : vector<2x4x256xf32>
    %7 = arith.mulf %6, %6 : vector<2x4x256xf32>
    %cst_3 = arith.constant dense<0.000000e+00> : vector<2x256xf32>
    %8 = vector.multi_reduction <add>, %7, %cst_3 [1] : vector<2x4x256xf32> to vector<2x256xf32>
    %9 = vector.shape_cast %8 : vector<2x256xf32> to vector<2x1x256xf32>
    %cst_4 = arith.constant 2.500000e-01 : f32
    %10 = vector.broadcast %cst_4 : f32 to vector<2x1x256xf32>
    %11 = arith.mulf %9, %10 : vector<2x1x256xf32>
    %cst_5 = arith.constant 9.99999974E-6 : f32
    %12 = vector.broadcast %cst_5 : f32 to vector<2x1x256xf32>
    %13 = arith.addf %11, %12 : vector<2x1x256xf32>
    %14 = math.rsqrt %13 : vector<2x1x256xf32>
    %c0_6 = arith.constant 0 : index
    %c0_7 = arith.constant 0 : index
    %c0_8 = arith.constant 0 : index
    %15 = vector.load %arg3[%c0_6, %c0_7, %c0_8] : memref<1x4x1xf32, #tpu.memory_space<vmem>>, vector<1x4x1xf32>
    %16 = vector.broadcast %14 : vector<2x1x256xf32> to vector<2x4x256xf32>
    %17 = arith.mulf %6, %16 : vector<2x4x256xf32>
    %18 = vector.broadcast %15 : vector<1x4x1xf32> to vector<2x4x256xf32>
    %19 = arith.mulf %17, %18 : vector<2x4x256xf32>
    %c0_9 = arith.constant 0 : index
    %c0_10 = arith.constant 0 : index
    %c0_11 = arith.constant 0 : index
    %20 = vector.load %arg4[%c0_9, %c0_10, %c0_11] : memref<2x4x256xf32, #tpu.memory_space<vmem>>, vector<2x4x256xf32>
    tpu.vector_store %arg4[%c0_9, %c0_10, %c0_11], %19 {strides = array<i32>} : memref<2x4x256xf32, #tpu.memory_space<vmem>>, vector<2x4x256xf32>,
    return
  }
  func.func @transform_0(%arg0: i32, %arg1: i32) -> (i32, i32, i32) {
    %c0_i32 = arith.constant 0 : i32
    %c0_i32_0 = arith.constant 0 : i32
    return %arg0, %c0_i32, %arg1 : i32, i32, i32
  }
  func.func @transform_1(%arg0: i32, %arg1: i32) -> (i32, i32, i32) {
    %c0_i32 = arith.constant 0 : i32
    %c0_i32_0 = arith.constant 0 : i32
    %c0_i32_1 = arith.constant 0 : i32
    %c0_i32_2 = arith.constant 0 : i32
    return %c0_i32, %c0_i32_0, %c0_i32_1 : i32, i32, i32
  }
  func.func @transform_2(%arg0: i32, %arg1: i32) -> (i32, i32, i32) {
    %c0_i32 = arith.constant 0 : i32
    %c0_i32_0 = arith.constant 0 : i32
    return %arg0, %c0_i32, %arg1 : i32, i32, i32
  }
}

</mosaic_0001>

<bundles_post_ra>
// kernel: tpu_custom_call.1
= control target key start
LH: loop header
LB: loop body
LE: loop exit
PB: predicated region body
PF: predicated region fallthrough
CT: control target
= control target key end

     0   :  { %7 = vsyncpa [#allocation3], 0  ;;  %s274_s0 = inlined_call_operand.hbm [shape: f32[2,4,256], index: 0, kind: input, shape index: {}]   ;;  %s275_s1 = inlined_call_operand.vmem [shape: f32[1,4,1], index: 1, kind: input, shape index: {}]   ;;  %s276_s2 = inlined_call_operand.hbm [shape: f32[2,4,256], index: 2, kind: output, shape index: {}]  }
   0x1   :  { %8 = vsyncpa [#allocation4], 0  ;;  %s230_s9 = smov [#allocation2]  }
   0x2   :  { %s14_s10 = sshll.u32 %s230_s9, 4  ;;  %s15_s10 = int_to_ptr.vmem [resolvable:$true] %s14_s10 }
   0x3   :  { %s194_s11 = scalar_lea.vmem %s15_s10, 256  ;;  %p199_p1 = scmp.lt.s32.totalorder %s15_s10, %s15_s10 }
   0x4   :  { %p195_p0 = scmp.ne.s32.totalorder %s15_s10, %s194_s11  ;;  %p200_p2 = scmp.lt.s32.totalorder %s194_s11, %s194_s11 }
   0x6   :  { %p201_p3 = por %p200_p2, %p199_p1 }
   0x8   :  { %p202_p4 = pnand %p201_p3, %p195_p0 }
   0xa   :  { %205 = shalt.err (!%p202_p4)
}
   0xb   :  { %s231_s12 = smov 128   ;;  %s232_s13 = smov 8  }
   0xc   :  { %20 = dma.hbm_to_vmem [thread:$0]  %s274_s0, 256, %s15_s10, [#allocation3], %s231_s12, %s231_s12, %s232_s13  }
   0xd   :  { %226 = dma.done.wait [#allocation3], 256  }
   0xe   :  { %227 = vsyncadd [#allocation3], 4294967040  ;;  %v233_v0 = vmov 0   ;;  %v125_v1 = vld [vmem:[%s275_s1] sm:$0xf]  ;;  %v27_v3 = vld [vmem:[#allocation2 + $0x8] sm:$0xff] }
   0xf   :  { %175 = vset.pattern.permute.xlu0 %v233_v0  ;;  %v26_v2 = vld [vmem:[#allocation2] sm:$0xff]  ;;  %vm34_vm0 = vcmask 1043456   ;;  %v31_v5 = vcombine.high %v27_v3, %v27_v3  ;;  %s235_s0 = smov [#allocation5]  }
  0x10   :  { %138 = vperm.xlu0 %175, %v125_v1   ;;  %v30_v4 = vcombine.high %v26_v2, %v26_v2  ;;  %v35_v6 = vsel %vm34_vm0, %v26_v2, 0.0  ;;  %v49_v8 = vsel %vm34_vm0, %v27_v3, 0.0  ;;  %s157_s1 = sshll.u32 %s235_s0, 4  ;;  %s158_s1 = int_to_ptr.vmem [resolvable:$true] %s157_s1 }
  0x11   :  { %v56_v9 = vsel %vm34_vm0, %v31_v5, 0.0  ;;  %v36_v10 = vrot.slane %v35_v6, 4  ;;  %v50_v12 = vrot.slane %v49_v8, 4  ;;  %s206_s18 = scalar_lea.vmem %s158_s1, 256  ;;  %p211_p6 = scmp.lt.s32.totalorder %s158_s1, %s158_s1 }
  0x12   :  { %v42_v7 = vsel %vm34_vm0, %v30_v4, 0.0  ;;  %v57_v13 = vrot.slane %v56_v9, 4  ;;  %p207_p5 = scmp.ne.s32.totalorder %s158_s1, %s206_s18  ;;  %p212_p7 = scmp.lt.s32.totalorder %s206_s18, %s206_s18 }
  0x13   :  { %v43_v11 = vrot.slane %v42_v7, 4  ;;  %v37_v14 = vadd.f32 %v36_v10, %v35_v6  ;;  %v51_v16 = vadd.f32 %v50_v12, %v49_v8 }
  0x14   :  { %v58_v17 = vadd.f32 %v57_v13, %v56_v9  ;;  %p213_p8 = por %p212_p7, %p211_p6 }
  0x15   :  { %v44_v15 = vadd.f32 %v43_v11, %v42_v7  ;;  %v38_v18 = vrot.slane %v37_v14, 2  ;;  %v52_v20 = vrot.slane %v51_v16, 2 }
  0x16   :  { %v59_v21 = vrot.slane %v58_v17, 2  ;;  %p214_p9 = pnand %p213_p8, %p207_p5 }
  0x17   :  { %v45_v19 = vrot.slane %v44_v15, 2  ;;  %v39_v22 = vadd.f32 %v38_v18, %v37_v14  ;;  %v53_v24 = vadd.f32 %v52_v20, %v51_v16 }
  0x18   :  { %v60_v25 = vadd.f32 %v59_v21, %v58_v17  ;;  %v143_v21 = vlaneseq }
  0x19   :  { %v46_v23 = vadd.f32 %v45_v19, %v44_v15  ;;  %v40_v26 = vrot.slane %v39_v22, 1  ;;  %v54_v28 = vrot.slane %v53_v24, 1  ;;  %v234_v19 = vmov 839922192  }
  0x1a   :  { %v61_v29 = vrot.slane %v60_v25, 1  ;;  %v141_v20 = vunpack.c.l.s4 %v234_v19 }
  0x1b   :  { %v47_v27 = vrot.slane %v46_v23, 1  ;;  %v41_v30 = vadd.f32 %v40_v26, %v39_v22  ;;  %v55_v32 = vadd.f32 %v54_v28, %v53_v24  ;;  %v144_v26 = vshrl.u32 %v143_v21, 7 }
  0x1c   :  { %v62_v33 = vadd.f32 %v61_v29, %v60_v25  ;;  %v142_v25 = vunpack.c.0.s8 %v141_v20 }
  0x1d   :  { %v48_v31 = vadd.f32 %v47_v27, %v46_v23  ;;  %v63_v34 = vmul.f32 0.25, %v41_v30  ;;  %v65_v36 = vmul.f32 0.25, %v55_v32 }
  0x1e   :  { %v66_v37 = vmul.f32 0.25, %v62_v33  ;;  %v145_v29 = vsub.s32 %v142_v25, %v144_v26 }
  0x1f   :  { %v64_v35 = vmul.f32 0.25, %v48_v31 }
  0x20   :  { %v72_v39 = vcombine.low %v65_v36, %v66_v37 }
  0x21   :  { %v71_v38 = vcombine.low %v63_v34, %v64_v35 }
  0x22   :  { %v76_v41 = vsub.f32 %v27_v3, %v72_v39 }
  0x23   :  { %v75_v40 = vsub.f32 %v26_v2, %v71_v38 }
  0x24   :  { %v78_v43 = vmul.f32 %v76_v41, %v76_v41 }
  0x25   :  { %v77_v42 = vmul.f32 %v75_v40, %v75_v40 }
  0x26   :  { %v82_v45 = vcombine.high %v78_v43, %v78_v43  ;;  %v99_v47 = vsel %vm34_vm0, %v78_v43, 0.0 }
  0x27   :  { %v81_v44 = vcombine.high %v77_v42, %v77_v42  ;;  %v85_v46 = vsel %vm34_vm0, %v77_v42, 0.0  ;;  %v100_v51 = vrot.slane %v99_v47, 4 }
  0x28   :  { %v86_v49 = vrot.slane %v85_v46, 4  ;;  %v106_v50 = vsel %vm34_vm0, %v82_v45, 0.0 }
  0x29   :  { %v92_v48 = vsel %vm34_vm0, %v81_v44, 0.0  ;;  %v107_v53 = vrot.slane %v106_v50, 4  ;;  %v101_v55 = vadd.f32 %v100_v51, %v99_v47 }
  0x2a   :  { %v93_v52 = vrot.slane %v92_v48, 4  ;;  %v87_v54 = vadd.f32 %v86_v49, %v85_v46 }
  0x2b   :  { %v108_v57 = vadd.f32 %v107_v53, %v106_v50  ;;  %v102_v59 = vrot.slane %v101_v55, 2 }
  0x2c   :  { %v94_v56 = vadd.f32 %v93_v52, %v92_v48  ;;  %v88_v58 = vrot.slane %v87_v54, 2 }
  0x2d   :  { %v109_v61 = vrot.slane %v108_v57, 2  ;;  %v103_v63 = vadd.f32 %v102_v59, %v101_v55 }
  0x2e   :  { %v95_v60 = vrot.slane %v94_v56, 2  ;;  %v89_v62 = vadd.f32 %v88_v58, %v87_v54 }
  0x2f   :  { %v110_v1 = vadd.f32 %v109_v61, %v108_v57  ;;  %v104_v3 = vrot.slane %v103_v63, 1 }
  0x30   :  { %v96_v0 = vadd.f32 %v95_v60, %v94_v56  ;;  %v90_v2 = vrot.slane %v89_v62, 1 }
  0x31   :  { %v111_v5 = vrot.slane %v110_v1, 1  ;;  %v105_v7 = vadd.f32 %v104_v3, %v103_v63 }
  0x32   :  { %v97_v4 = vrot.slane %v96_v0, 1  ;;  %v91_v6 = vadd.f32 %v90_v2, %v89_v62 }
  0x33   :  { %v112_v9 = vadd.f32 %v111_v5, %v110_v1  ;;  %v115_v11 = vmul.f32 0.25, %v105_v7 }
  0x34   :  { %v98_v8 = vadd.f32 %v97_v4, %v96_v0  ;;  %v113_v10 = vmul.f32 0.25, %v91_v6 }
  0x35   :  { %v116_v13 = vmul.f32 0.25, %v112_v9  ;;  %v119_v15 = vadd.f32 1e-05, %v115_v11 }
  0x36   :  { %v114_v12 = vmul.f32 0.25, %v98_v8  ;;  %v117_v14 = vadd.f32 1e-05, %v113_v10 }
  0x37   :  { %v120_v17 = vadd.f32 1e-05, %v116_v13 }
  0x38   :  { %v118_v16 = vadd.f32 1e-05, %v114_v12  ;;  %178 = vrsqrt.f32 %v117_v14 }
  0x39   :  { %180 = vrsqrt.f32 %v119_v15 }
  0x3a   :  { %182 = vrsqrt.f32 %v118_v16 }
  0x3b   :  { %184 = vrsqrt.f32 %v120_v17 }
  0x45   :  { %v179_v18 = vpop.eup %178 }
  0x46   :  { %v181_v22 = vpop.eup %180 }
  0x47   :  { %v183_v23 = vpop.eup %182 }
  0x48   :  { %v185_v24 = vpop.eup %184  ;;  %v130_v27 = vcombine.low %v179_v18, %v183_v23 }
  0x49   :  { %v131_v28 = vcombine.low %v181_v22, %v185_v24 }
  0x4a   :  { %v134_v30 = vmul.f32 %v130_v27, %v75_v40 }
  0x4b   :  { %v135_v31 = vmul.f32 %v131_v28, %v76_v41 }
  0x8b   :  { %v139_v32 = vpop.permute.xlu0 %138 }
  0x8c   :  { %v146_v33 = vrot.slane %v139_v32, %v145_v29 }
  0x8e   :  { %v148_v34 = vmul.f32 %v146_v33, %v134_v30  ;;  %v149_v35 = vmul.f32 %v146_v33, %v135_v31 }
  0x90   :  { %150 = vst [vmem:[#allocation5] sm:$0xff] %v148_v34  ;;  %151 = vst [vmem:[#allocation5 + $0x8] sm:$0xff] %v149_v35 }
  0x91   :  { %217 = shalt.err (!%p214_p9)
}
  0x92   :  { %163 = dma.vmem_to_hbm [thread:$0]  %s158_s1, 256, %s276_s2, [#allocation4], %s231_s12, %s231_s12, %s232_s13  }
  0x93   :  { %228 = dma.done.wait [#allocation4], 256  }
  0x94   :  { %229 = vsyncadd [#allocation4], 4294967040 }
  0x95   :  { %167 = vsyncpa [#allocation3], 1 }
  0x96   :  { %168 = vsyncpa [#allocation4], 1 }

</bundles_post_ra>
